<compile_context>
chip_gen: v7x
topology: tpu7x:2x2x1
jax: 0.10.0
libtpu: 0.0.40
codegen_flags: <defaults>
</compile_context>

<pallas_src>
import jax
import jax.numpy as jnp
from jax.experimental import pallas as pl
from jax.experimental.pallas import tpu as pltpu

IN_FEATURES = 28 * 28   # 784 (full-extent block dim; no K padding needed)
HIDDEN = 256
LANE = 128
TM_MAX = 1024           # large batch tile -> ~85%+ of HBM roofline
MIN_TC_SPLIT = 64       # below this batch, a single grid step is cheaper


def _round_up(x, m):
    return (x + m - 1) // m * m


def _mlp_kernel(x_ref, w1_ref, b1_ref, w2_ref, b2_ref, out_ref):
    # In-kernel f32 -> bf16 cast of the activations (free under DMA/MXU slack),
    # two bf16 MXU matmuls with f32 accumulation, bias + ReLU on the VPU in f32.
    x = x_ref[...].astype(jnp.bfloat16)                          # [TM, 784] bf16
    h = jnp.dot(x, w1_ref[...], preferred_element_type=jnp.float32)
    h = jnp.maximum(h + b1_ref[...], 0.0)                        # [TM, 256] f32
    y = jnp.dot(h.astype(jnp.bfloat16), w2_ref[...],
                preferred_element_type=jnp.float32)              # [TM, C_pad] f32
    out_ref[...] = (y + b2_ref[...]).astype(out_ref.dtype)


def prepare_params(w1, b1, w2, b2):
    """One-time weight prep: cast matmul weights to bf16, pad classes to 128 lanes.

    w1: [784, 256] -> bf16 (no K padding; 784 is a legal full-extent block dim)
    w2: [256, C]   -> [256, C_pad=round_up(C,128)] bf16 (zero cols, exact no-op)
    b1: [1, 256] f32;  b2: [1, C] -> [1, C_pad] f32
    """
    c = w2.shape[1]
    c_pad = _round_up(c, LANE)
    w1p = w1.astype(jnp.bfloat16)
    w2p = jnp.zeros((HIDDEN, c_pad), jnp.bfloat16).at[:, :c].set(
        w2.astype(jnp.bfloat16))
    b2p = jnp.zeros((1, c_pad), jnp.float32).at[:, :c].set(b2.astype(jnp.float32))
    return w1p, b1.astype(jnp.float32), w2p, b2p


def el_vostre_forward(x_nchw, w1p, b1, w2p, b2p, num_classes):
    """x_nchw: [B, 1, 28, 28] float32. Returns logits [B, num_classes] f32."""
    B = x_nchw.shape[0]
    c_pad = w2p.shape[1]

    # nn.Flatten(): contiguous reshape only (no HBM copy); kernel ingests f32.
    x2d = x_nchw.reshape(B, -1)

    # Balanced batch tiles: tm is a multiple of 8 sublanes, capped at TM_MAX,
    # with >=2 grid steps for larger batches so v7x's 2 TensorCores both work.
    n_tiles = pl.cdiv(B, TM_MAX)
    if B >= MIN_TC_SPLIT:
        n_tiles = max(2, n_tiles)
    tm = _round_up(pl.cdiv(B, n_tiles), 8)
    b_pad = n_tiles * tm
    if b_pad != B:
        x2d = jnp.pad(x2d, ((0, b_pad - B), (0, 0)))
    grid = (n_tiles,)

    cost = pl.CostEstimate(
        flops=2 * b_pad * (IN_FEATURES * HIDDEN + HIDDEN * c_pad),
        transcendentals=0,
        bytes_accessed=(b_pad * IN_FEATURES * 4        # x (f32, cast in-kernel)
                        + IN_FEATURES * HIDDEN * 2     # w1 (bf16)
                        + HIDDEN * c_pad * 2           # w2 (bf16)
                        + HIDDEN * 4 + c_pad * 4       # biases (f32)
                        + b_pad * c_pad * 4),          # out (f32)
    )

    out = pl.pallas_call(
        _mlp_kernel,
        out_shape=jax.ShapeDtypeStruct((b_pad, c_pad), jnp.float32),
        grid_spec=pltpu.PrefetchScalarGridSpec(
            num_scalar_prefetch=0,
            grid=grid,
            in_specs=[
                # Activations: tiled over batch -> pipelined DMA.
                # Last dim (784) equals the full array extent -> legal block.
                pl.BlockSpec((tm, IN_FEATURES), lambda i: (i, 0)),
                # Weights / biases: constant block index -> VMEM-resident.
                pl.BlockSpec((IN_FEATURES, HIDDEN), lambda i: (0, 0)),
                pl.BlockSpec((1, HIDDEN), lambda i: (0, 0)),
                pl.BlockSpec((HIDDEN, c_pad), lambda i: (0, 0)),
                pl.BlockSpec((1, c_pad), lambda i: (0, 0)),
            ],
            # Lane-dense (multiple-of-128) output block -> unmasked stores.
            out_specs=pl.BlockSpec((tm, c_pad), lambda i: (i, 0)),
        ),
        compiler_params=pltpu.CompilerParams(
            dimension_semantics=("parallel",),   # batch tiles independent
        ),
        cost_estimate=cost,
    )(x2d, w1p, b1, w2p, b2p)

    # Strip batch / class padding.
    return out[:B, :num_classes]


def init_params(key, num_classes):
    """Deterministic init matching nn.Linear shapes (stored as [in, out], f32)."""
    k1, k2, k3, k4 = jax.random.split(key, 4)
    bound1 = 1.0 / jnp.sqrt(IN_FEATURES)
    bound2 = 1.0 / jnp.sqrt(HIDDEN)
    w1 = jax.random.uniform(k1, (IN_FEATURES, HIDDEN), jnp.float32,
                            minval=-bound1, maxval=bound1)
    b1 = jax.random.uniform(k2, (1, HIDDEN), jnp.float32,
                            minval=-bound1, maxval=bound1)
    w2 = jax.random.uniform(k3, (HIDDEN, num_classes), jnp.float32,
                            minval=-bound2, maxval=bound2)
    b2 = jax.random.uniform(k4, (1, num_classes), jnp.float32,
                            minval=-bound2, maxval=bound2)
    return w1, b1, w2, b2


if __name__ == "__main__":
    key = jax.random.PRNGKey(0)
    k_x, k_p = jax.random.split(key)

    batch = 8
    num_classes = 10  # synthetic class count (ImageFolder classes unknown here)

    # Grayscale NCHW input, 28x28 as implied by Linear(28*28, 256).
    x = jax.random.uniform(k_x, (batch, 1, 28, 28), jnp.float32)
    w1, b1, w2, b2 = init_params(k_p, num_classes)
    w1p, b1p, w2p, b2p = prepare_params(w1, b1, w2, b2)

    logits = el_vostre_forward(x, w1p, b1p, w2p, b2p, num_classes)
    jax.block_until_ready(logits)
    assert logits.shape == (batch, num_classes)

    # Reference 1: plain-JAX forward with the same bf16 casts (tight check).
    x2d = x.reshape(batch, -1)
    h_ref = jnp.maximum(
        jnp.dot(x2d.astype(jnp.bfloat16), w1.astype(jnp.bfloat16),
                preferred_element_type=jnp.float32) + b1, 0.0)
    ref_bf16 = jnp.dot(h_ref.astype(jnp.bfloat16), w2.astype(jnp.bfloat16),
                       preferred_element_type=jnp.float32) + b2
    assert jnp.allclose(logits, ref_bf16, atol=2e-2, rtol=2e-2)

    # Reference 2: full-f32 forward (loose check — bf16 matmul error budget).
    ref_f32 = jnp.maximum(x2d @ w1 + b1, 0.0) @ w2 + b2
    assert jnp.allclose(logits, ref_f32, atol=1e-1, rtol=1e-1)

    # Sanity: a batch size that exercises >1 grid step and batch padding.
    x_big = jax.random.uniform(k_x, (130, 1, 28, 28), jnp.float32)
    logits_big = el_vostre_forward(x_big, w1p, b1p, w2p, b2p, num_classes)
    jax.block_until_ready(logits_big)
    ref_big = jnp.maximum(x_big.reshape(130, -1) @ w1 + b1, 0.0) @ w2 + b2
    assert logits_big.shape == (130, num_classes)
    assert jnp.allclose(logits_big, ref_big, atol=1e-1, rtol=1e-1)

    print("KERNEL_OK")
</pallas_src>

<mosaic_0001>
module attributes {stable_mosaic.version = 11 : i64} {
  func.func @_mlp_kernel(%arg0: i32, %arg1: memref<8x784xf32, #tpu.memory_space<vmem>>, %arg2: memref<784x256xbf16, #tpu.memory_space<vmem>>, %arg3: memref<1x256xf32, #tpu.memory_space<vmem>>, %arg4: memref<256x128xbf16, #tpu.memory_space<vmem>>, %arg5: memref<1x128xf32, #tpu.memory_space<vmem>>, %arg6: memref<8x128xf32, #tpu.memory_space<vmem>>) attributes {dimension_semantics = [#tpu.dimension_semantics<parallel>], iteration_bounds = array<i64: 1>, scalar_prefetch = 0 : i64, scratch_operands = 0 : i64, tpu.core_type = #tpu.core_type<tc>, window_params = [{transform_indices = @transform_0, window_bounds = array<i64: 8, 784>}, {pipeline_mode = #tpu.pipeline_mode<synchronous>, transform_indices = @transform_1, window_bounds = array<i64: 784, 256>}, {pipeline_mode = #tpu.pipeline_mode<synchronous>, transform_indices = @transform_2, window_bounds = array<i64: 1, 256>}, {pipeline_mode = #tpu.pipeline_mode<synchronous>, transform_indices = @transform_3, window_bounds = array<i64: 256, 128>}, {pipeline_mode = #tpu.pipeline_mode<synchronous>, transform_indices = @transform_4, window_bounds = array<i64: 1, 128>}, {transform_indices = @transform_5, window_bounds = array<i64: 8, 128>}]} {
    %c0 = arith.constant 0 : index
    %c0_0 = arith.constant 0 : index
    %0 = vector.load %arg1[%c0, %c0_0] : memref<8x784xf32, #tpu.memory_space<vmem>>, vector<8x784xf32>
    %1 = arith.truncf %0 : vector<8x784xf32> to vector<8x784xbf16>
    %c0_1 = arith.constant 0 : index
    %c0_2 = arith.constant 0 : index
    %2 = vector.load %arg2[%c0_1, %c0_2] : memref<784x256xbf16, #tpu.memory_space<vmem>>, vector<784x256xbf16>
    %cst = arith.constant dense<0.000000e+00> : vector<8x256xf32>
    %3 = tpu.matmul %1, %2, %cst {dimension_numbers = #tpu.dot_dimension_numbers<[1], [0], [0], [1], [0, 0, 1, 1], [], []>} : vector<8x784xbf16>, vector<784x256xbf16>, vector<8x256xf32> -> vector<8x256xf32>
    %c0_3 = arith.constant 0 : index
    %c0_4 = arith.constant 0 : index
    %4 = vector.load %arg3[%c0_3, %c0_4] : memref<1x256xf32, #tpu.memory_space<vmem>>, vector<1x256xf32>
    %5 = vector.broadcast %4 : vector<1x256xf32> to vector<8x256xf32>
    %6 = arith.addf %3, %5 : vector<8x256xf32>
    %cst_5 = arith.constant 0.000000e+00 : f32
    %7 = vector.broadcast %cst_5 : f32 to vector<8x256xf32>
    %8 = arith.maximumf %6, %7 : vector<8x256xf32>
    %9 = arith.truncf %8 : vector<8x256xf32> to vector<8x256xbf16>
    %c0_6 = arith.constant 0 : index
    %c0_7 = arith.constant 0 : index
    %10 = vector.load %arg4[%c0_6, %c0_7] : memref<256x128xbf16, #tpu.memory_space<vmem>>, vector<256x128xbf16>
    %cst_8 = arith.constant dense<0.000000e+00> : vector<8x128xf32>
    %11 = tpu.matmul %9, %10, %cst_8 {dimension_numbers = #tpu.dot_dimension_numbers<[1], [0], [0], [1], [0, 0, 1, 1], [], []>} : vector<8x256xbf16>, vector<256x128xbf16>, vector<8x128xf32> -> vector<8x128xf32>
    %c0_9 = arith.constant 0 : index
    %c0_10 = arith.constant 0 : index
    %12 = vector.load %arg5[%c0_9, %c0_10] : memref<1x128xf32, #tpu.memory_space<vmem>>, vector<1x128xf32>
    %13 = vector.broadcast %12 : vector<1x128xf32> to vector<8x128xf32>
    %14 = arith.addf %11, %13 : vector<8x128xf32>
    %c0_11 = arith.constant 0 : index
    %c0_12 = arith.constant 0 : index
    %15 = vector.load %arg6[%c0_11, %c0_12] : memref<8x128xf32, #tpu.memory_space<vmem>>, vector<8x128xf32>
    tpu.vector_store %arg6[%c0_11, %c0_12], %14 {strides = array<i32>} : memref<8x128xf32, #tpu.memory_space<vmem>>, vector<8x128xf32>,
    return
  }
  func.func @transform_0(%arg0: i32) -> (i32, i32) {
    %c0_i32 = arith.constant 0 : i32
    %c0_i32_0 = arith.constant 0 : i32
    return %arg0, %c0_i32 : i32, i32
  }
  func.func @transform_1(%arg0: i32) -> (i32, i32) {
    %c0_i32 = arith.constant 0 : i32
    %c0_i32_0 = arith.constant 0 : i32
    %c0_i32_1 = arith.constant 0 : i32
    return %c0_i32, %c0_i32_0 : i32, i32
  }
  func.func @transform_2(%arg0: i32) -> (i32, i32) {
    %c0_i32 = arith.constant 0 : i32
    %c0_i32_0 = arith.constant 0 : i32
    %c0_i32_1 = arith.constant 0 : i32
    return %c0_i32, %c0_i32_0 : i32, i32
  }
  func.func @transform_3(%arg0: i32) -> (i32, i32) {
    %c0_i32 = arith.constant 0 : i32
    %c0_i32_0 = arith.constant 0 : i32
    %c0_i32_1 = arith.constant 0 : i32
    return %c0_i32, %c0_i32_0 : i32, i32
  }
  func.func @transform_4(%arg0: i32) -> (i32, i32) {
    %c0_i32 = arith.constant 0 : i32
    %c0_i32_0 = arith.constant 0 : i32
    %c0_i32_1 = arith.constant 0 : i32
    return %c0_i32, %c0_i32_0 : i32, i32
  }
  func.func @transform_5(%arg0: i32) -> (i32, i32) {
    %c0_i32 = arith.constant 0 : i32
    %c0_i32_0 = arith.constant 0 : i32
    return %arg0, %c0_i32 : i32, i32
  }
}

</mosaic_0001>

<bundles_post_ra>
// kernel: tpu_custom_call.1
= control target key start
LH: loop header
LB: loop body
LE: loop exit
PB: predicated region body
PF: predicated region fallthrough
CT: control target
= control target key end

     0   :  { %10 = vsyncpa [#allocation3], 0  ;;  %s1546_s0 = inlined_call_operand.hbm [shape: f32[8,784], index: 0, kind: input, shape index: {}]   ;;  %s1547_s1 = inlined_call_operand.hbm [shape: bf16[784,256], index: 1, kind: input, shape index: {}]   ;;  %s1548_s2 = inlined_call_operand.vmem [shape: f32[1,256], index: 2, kind: input, shape index: {}]   ;;  %s1549_s3 = inlined_call_operand.hbm [shape: bf16[256,128], index: 3, kind: input, shape index: {}]   ;;  %s1550_s4 = inlined_call_operand.vmem [shape: f32[1,128], index: 4, kind: input, shape index: {}]   ;;  %s1551_s5 = inlined_call_operand.hbm [shape: f32[8,128], index: 5, kind: output, shape index: {}]  }
   0x1   :  { %11 = vsyncpa [#allocation6], 0 }
   0x2   :  { %12 = vsyncpa [#allocation4], 0  ;;  %s1453_s18 = smov [#allocation5]   ;;  %s1359_s22 = scalar_lea.hbm %s1547_s1, 12544 }
   0x3   :  { %s28_s19 = sshll.u32 %s1453_s18, 4  ;;  %p1360_p0 = scmp.ne.s32.totalorder %s1547_s1, %s1359_s22  ;;  %s29_s19 = int_to_ptr.vmem [resolvable:$true] %s28_s19 }
   0x4   :  { %p1363_p1 = scmp.lt.u32.totalorder %s1359_s22, %s1547_s1 }
   0x6   :  { %p1365_p2 = pnand %p1363_p1, %p1360_p0 }
   0x8   :  { %1368 = shalt.err (!%p1365_p2)
}
   0x9   :  { %s1369_s27 = scalar_lea.vmem %s29_s19, 12544  ;;  %p1374_p4 = scmp.lt.s32.totalorder %s29_s19, %s29_s19 }
   0xa   :  { %p1370_p3 = scmp.ne.s32.totalorder %s29_s19, %s1369_s27  ;;  %p1375_p5 = scmp.lt.s32.totalorder %s1369_s27, %s1369_s27 }
   0xc   :  { %p1376_p6 = por %p1375_p5, %p1374_p4 }
   0xe   :  { %p1377_p7 = pnand %p1376_p6, %p1370_p3 }
  0x10   :  { %1380 = shalt.err (!%p1377_p7)
}
  0x11   :  { %s1454_s28 = smov 128   ;;  %s1455_s29 = smov 8  }
  0x12   :  { %34 = dma.hbm_to_vmem [thread:$0]  %s1547_s1, 12544, %s29_s19, [#allocation6], %s1454_s28, %s1454_s28, %s1455_s29  }
  0x13   :  { %s1456_s7 = smov [#allocation2]   ;;  %s1457_s9 = smov [#allocation7]  }
  0x14   :  { %s19_s8 = sshll.u32 %s1456_s7, 4  ;;  %s42_s10 = sshll.u32 %s1457_s9, 4  ;;  %s20_s8 = int_to_ptr.vmem [resolvable:$true] %s19_s8  ;;  %s43_s10 = int_to_ptr.vmem [resolvable:$true] %s42_s10 }
  0x15   :  { %s1381_s13 = scalar_lea.hbm %s1546_s0, 896 }
  0x16   :  { %p1382_p8 = scmp.ne.s32.totalorder %s1546_s0, %s1381_s13  ;;  %p1385_p9 = scmp.lt.u32.totalorder %s1381_s13, %s1546_s0 }
  0x18   :  { %p1387_p10 = pnand %p1385_p9, %p1382_p8 }
  0x1a   :  { %1390 = shalt.err (!%p1387_p10)
}
  0x1b   :  { %s1391_s1 = scalar_lea.vmem %s20_s8, 896  ;;  %p1396_p12 = scmp.lt.s32.totalorder %s20_s8, %s20_s8 }
  0x1c   :  { %p1392_p11 = scmp.ne.s32.totalorder %s20_s8, %s1391_s1  ;;  %p1397_p13 = scmp.lt.s32.totalorder %s1391_s1, %s1391_s1 }
  0x1e   :  { %p1398_p0 = por %p1397_p13, %p1396_p12 }
  0x20   :  { %p1399_p1 = pnand %p1398_p0, %p1392_p11 }
  0x22   :  { %1402 = shalt.err (!%p1399_p1)
}
  0x23   :  { %22 = dma.hbm_to_vmem [thread:$0]  %s1546_s0, 896, %s20_s8, [#allocation3]  }
  0x24   :  { %s1403_s22 = scalar_lea.hbm %s1549_s3, 2048 }
  0x25   :  { %p1404_p2 = scmp.ne.s32.totalorder %s1549_s3, %s1403_s22  ;;  %p1407_p3 = scmp.lt.u32.totalorder %s1403_s22, %s1549_s3 }
  0x27   :  { %p1409_p4 = pnand %p1407_p3, %p1404_p2 }
  0x29   :  { %1412 = shalt.err (!%p1409_p4)
}
  0x2a   :  { %s1413_s27 = scalar_lea.vmem %s43_s10, 2048  ;;  %p1418_p6 = scmp.lt.s32.totalorder %s43_s10, %s43_s10 }
  0x2b   :  { %p1414_p5 = scmp.ne.s32.totalorder %s43_s10, %s1413_s27  ;;  %p1419_p7 = scmp.lt.s32.totalorder %s1413_s27, %s1413_s27 }
  0x2d   :  { %p1420_p8 = por %p1419_p7, %p1418_p6 }
  0x2f   :  { %p1421_p9 = pnand %p1420_p8, %p1414_p5 }
  0x31   :  { %1424 = shalt.err (!%p1421_p9)
}
  0x32   :  { %s1458_s0 = smov 64   ;;  %s1459_s28 = smov 4  }
  0x33   :  { %48 = dma.hbm_to_vmem [thread:$0]  %s1549_s3, 2048, %s43_s10, [#allocation6], %s1458_s0, %s1458_s0, %s1459_s28  }
  0x34   :  { %1447 = dma.done.wait [#allocation3], 896  }
  0x35   :  { %1448 = vsyncadd [#allocation3], 4294966400 }
  0x36   :  { %1449 = dma.done.wait [#allocation6], 14592  }
  0x37   :  { %1450 = vsyncadd [#allocation6], 4294952704  ;;  %v1196_v0 = vld [vmem:[#allocation5 + $0x104] ss:$8 sps:$4 sm:$0xff]   ;;  %v1198_v1 = vld [vmem:[#allocation5 + $0x100] ss:$8 sps:$4 sm:$0xff]  }
  0x38   :  { %720 = vmatprep.subr.bf16.mxu0 %v1196_v0  ;;  %v1199_v2 = vld [vmem:[#allocation5 + $0x114] ss:$8 sps:$4 sm:$0xff]   ;;  %v1201_v3 = vld [vmem:[#allocation5 + $0x110] ss:$8 sps:$4 sm:$0xff]   ;;  %v1202_v4 = vld [vmem:[#allocation5 + $0x124] ss:$8 sps:$4 sm:$0xff]  }
  0x39   :  { %721 = vmatpush1.bf16.msra.mxu0 %v1198_v1  ;;  %v1204_v5 = vld [vmem:[#allocation5 + $0x120] ss:$8 sps:$4 sm:$0xff]   ;;  %v1205_v6 = vld [vmem:[#allocation5 + $0x134] ss:$8 sps:$4 sm:$0xff]   ;;  %v1207_v7 = vld [vmem:[#allocation5 + $0x130] ss:$8 sps:$4 sm:$0xff]  }
  0x3a   :  { %722 = vmatprep.subr.bf16.mxu0 %v1199_v2  ;;  %v1208_v8 = vld [vmem:[#allocation5 + $0x144] ss:$8 sps:$4 sm:$0xff]   ;;  %v1210_v9 = vld [vmem:[#allocation5 + $0x140] ss:$8 sps:$4 sm:$0xff]   ;;  %v1211_v10 = vld [vmem:[#allocation5 + $0x154] ss:$8 sps:$4 sm:$0xff]  }
  0x3b   :  { %v1213_v11 = vld [vmem:[#allocation5 + $0x150] ss:$8 sps:$4 sm:$0xff]   ;;  %v1238_v12 = vld [vmem:[#allocation5 + $0x4] ss:$8 sps:$4 sm:$0xff]   ;;  %v1240_v13 = vld [vmem:[#allocation5] ss:$8 sps:$4 sm:$0xff]  }
  0x3c   :  { %v1214_v14 = vld [vmem:[#allocation5 + $0x164] ss:$8 sps:$4 sm:$0xff]   ;;  %679 = vmatprep.subr.bf16.mxu1 %v1238_v12  ;;  %v1244_v15 = vld [vmem:[#allocation5 + $0x14] ss:$8 sps:$4 sm:$0xff]   ;;  %v1246_v16 = vld [vmem:[#allocation5 + $0x10] ss:$8 sps:$4 sm:$0xff]  }
  0x3d   :  { %723 = vmatpush1.bf16.msra.mxu0 %v1201_v3  ;;  %680 = vmatpush1.bf16.msra.mxu1 %v1240_v13  ;;  %v1216_v17 = vld [vmem:[#allocation5 + $0x160] ss:$8 sps:$4 sm:$0xff]   ;;  %v1217_v18 = vld [vmem:[#allocation5 + $0x174] ss:$8 sps:$4 sm:$0xff]   ;;  %v1250_v19 = vld [vmem:[#allocation5 + $0x24] ss:$8 sps:$4 sm:$0xff]  }
  0x3e   :  { %724 = vmatprep.subr.bf16.mxu0 %v1202_v4  ;;  %681 = vmatprep.subr.bf16.mxu1 %v1244_v15  ;;  %v64_v20 = vld [vmem:[#allocation2 + $0x18] sm:$0xff]  ;;  %v1219_v23 = vld [vmem:[#allocation5 + $0x170] ss:$8 sps:$4 sm:$0xff]   ;;  %v1256_v25 = vld [vmem:[#allocation5 + $0x34] ss:$8 sps:$4 sm:$0xff]   ;;  %vm675_vm0 = vcmask 130048  }
  0x3f   :  { %v1252_v21 = vld [vmem:[#allocation5 + $0x20] ss:$8 sps:$4 sm:$0xff]   ;;  %v71_v22 = vpack.c.bf16 %v64_v20, %v64_v20  ;;  %v1220_v24 = vld [vmem:[#allocation5 + $0x184] ss:$8 sps:$4 sm:$0xff]   ;;  %v1258_v27 = vld [vmem:[#allocation5 + $0x30] ss:$8 sps:$4 sm:$0xff]  }
  0x40   :  { %v1222_v26 = vld [vmem:[#allocation5 + $0x180] ss:$8 sps:$4 sm:$0xff]   ;;  %v1262_v28 = vld [vmem:[#allocation5 + $0x44] ss:$8 sps:$4 sm:$0xff]   ;;  %v1223_v29 = vld [vmem:[#allocation5 + $0x194] ss:$8 sps:$4 sm:$0xff]  }
  0x41   :  { %725 = vmatpush1.bf16.msra.mxu0 %v1204_v5  ;;  %682 = vmatpush1.bf16.msra.mxu1 %v1246_v16  ;;  %v1225_v30 = vld [vmem:[#allocation5 + $0x190] ss:$8 sps:$4 sm:$0xff]   ;;  %v1264_v31 = vld [vmem:[#allocation5 + $0x40] ss:$8 sps:$4 sm:$0xff]   ;;  %v1268_v32 = vld [vmem:[#allocation5 + $0x54] ss:$8 sps:$4 sm:$0xff]  }
  0x42   :  { %726 = vmatprep.subr.bf16.mxu0 %v1205_v6  ;;  %683 = vmatprep.subr.bf16.mxu1 %v1250_v19  ;;  %v1226_v33 = vld [vmem:[#allocation5 + $0x1a4] ss:$8 sps:$4 sm:$0xff]   ;;  %v1228_v34 = vld [vmem:[#allocation5 + $0x1a0] ss:$8 sps:$4 sm:$0xff]   ;;  %v1270_v35 = vld [vmem:[#allocation5 + $0x50] ss:$8 sps:$4 sm:$0xff]  }
  0x43   :  { %752 = vmatprep.mubr.bf16.mxu0 %v71_v22  ;;  %v1274_v36 = vld [vmem:[#allocation5 + $0x64] ss:$8 sps:$4 sm:$0xff]   ;;  %v1229_v37 = vld [vmem:[#allocation5 + $0x1b4] ss:$8 sps:$4 sm:$0xff]   ;;  %v1231_v38 = vld [vmem:[#allocation5 + $0x1b0] ss:$8 sps:$4 sm:$0xff]  }
  0x44   :  { %v1276_v39 = vld [vmem:[#allocation5 + $0x60] ss:$8 sps:$4 sm:$0xff]   ;;  %v1280_v40 = vld [vmem:[#allocation5 + $0x74] ss:$8 sps:$4 sm:$0xff]   ;;  %v1232_v41 = vld [vmem:[#allocation5 + $0x1c4] ss:$8 sps:$4 sm:$0xff]  }
  0x45   :  { %727 = vmatpush1.bf16.msra.mxu0 %v1207_v7  ;;  %684 = vmatpush1.bf16.msra.mxu1 %v1252_v21  ;;  %v1234_v42 = vld [vmem:[#allocation5 + $0x1c0] ss:$8 sps:$4 sm:$0xff]   ;;  %v1282_v43 = vld [vmem:[#allocation5 + $0x70] ss:$8 sps:$4 sm:$0xff]   ;;  %v1286_v44 = vld [vmem:[#allocation5 + $0x84] ss:$8 sps:$4 sm:$0xff]  }
  0x46   :  { %728 = vmatprep.subr.bf16.mxu0 %v1208_v8  ;;  %685 = vmatprep.subr.bf16.mxu1 %v1256_v25  ;;  %v1235_v45 = vld [vmem:[#allocation5 + $0x1d4] ss:$8 sps:$4 sm:$0xff]   ;;  %v1237_v46 = vld [vmem:[#allocation5 + $0x1d0] ss:$8 sps:$4 sm:$0xff]   ;;  %v1288_v47 = vld [vmem:[#allocation5 + $0x80] ss:$8 sps:$4 sm:$0xff]  }
  0x47   :  { %v1292_v48 = vld [vmem:[#allocation5 + $0x94] ss:$8 sps:$4 sm:$0xff]   ;;  %v1241_v49 = vld [vmem:[#allocation5 + $0x1e4] ss:$8 sps:$4 sm:$0xff]   ;;  %v1243_v50 = vld [vmem:[#allocation5 + $0x1e0] ss:$8 sps:$4 sm:$0xff]  }
  0x48   :  { %v1294_v51 = vld [vmem:[#allocation5 + $0x90] ss:$8 sps:$4 sm:$0xff]   ;;  %v1298_v52 = vld [vmem:[#allocation5 + $0xa4] ss:$8 sps:$4 sm:$0xff]   ;;  %v1247_v53 = vld [vmem:[#allocation5 + $0x1f4] ss:$8 sps:$4 sm:$0xff]  }
  0x49   :  { %729 = vmatpush1.bf16.msra.mxu0 %v1210_v9  ;;  %686 = vmatpush1.bf16.msra.mxu1 %v1258_v27  ;;  %v1249_v54 = vld [vmem:[#allocation5 + $0x1f0] ss:$8 sps:$4 sm:$0xff]   ;;  %v1300_v56 = vld [vmem:[#allocation5 + $0xa0] ss:$8 sps:$4 sm:$0xff]   ;;  %v1304_v57 = vld [vmem:[#allocation5 + $0xb4] ss:$8 sps:$4 sm:$0xff]  }
  0x4a   :  { %730 = vmatprep.subr.bf16.mxu0 %v1211_v10  ;;  %687 = vmatprep.subr.bf16.mxu1 %v1262_v28  ;;  %v63_v55 = vld [vmem:[#allocation2 + $0x10] sm:$0xff]  ;;  %v1255_v58 = vld [vmem:[#allocation5 + $0x204] ss:$8 sps:$4 sm:$0xff]   ;;  %v62_v61 = vld [vmem:[#allocation2 + $0x8] sm:$0xff]  ;;  %s1461_s8 = smov [#allocation8]  }
  0x4b   :  { %v70_v59 = vpack.c.bf16 %v63_v55, %v63_v55  ;;  %v1306_v60 = vld [vmem:[#allocation5 + $0xb0] ss:$8 sps:$4 sm:$0xff]   ;;  %v1253_v62 = vld [vmem:[#allocation5 + $0x200] ss:$8 sps:$4 sm:$0xff]   ;;  %v1310_v63 = vld [vmem:[#allocation5 + $0xc4] ss:$8 sps:$4 sm:$0xff]   ;;  %v69_v0 = vpack.c.bf16 %v62_v61, %v62_v61 }
  0x4c   :  { %v1261_v1 = vld [vmem:[#allocation5 + $0x214] ss:$8 sps:$4 sm:$0xff]   ;;  %v1312_v2 = vld [vmem:[#allocation5 + $0xc0] ss:$8 sps:$4 sm:$0xff]   ;;  %v1259_v4 = vld [vmem:[#allocation5 + $0x210] ss:$8 sps:$4 sm:$0xff]  }
  0x4d   :  { %731 = vmatpush1.bf16.msra.mxu0 %v1213_v11  ;;  %688 = vmatpush1.bf16.msra.mxu1 %v1264_v31  ;;  %v66_v3 = vld [vmem:[#allocation2 + $0x28] sm:$0xff]  ;;  %v1267_v7 = vld [vmem:[#allocation5 + $0x224] ss:$8 sps:$4 sm:$0xff]   ;;  %v1265_v8 = vld [vmem:[#allocation5 + $0x220] ss:$8 sps:$4 sm:$0xff]   ;;  %s1029_s9 = sshll.u32 %s1461_s8, 4  ;;  %s1030_s9 = int_to_ptr.vmem [resolvable:$true] %s1029_s9 }
  0x4e   :  { %732 = vmatprep.subr.bf16.mxu0 %v1214_v14  ;;  %689 = vmatprep.subr.bf16.mxu1 %v1268_v32  ;;  %v1316_v5 = vld [vmem:[#allocation5 + $0xd4] ss:$8 sps:$4 sm:$0xff]   ;;  %v73_v6 = vpack.c.bf16 %v66_v3, %v66_v3  ;;  %v1318_v9 = vld [vmem:[#allocation5 + $0xd0] ss:$8 sps:$4 sm:$0xff]   ;;  %v1322_v10 = vld [vmem:[#allocation5 + $0xe4] ss:$8 sps:$4 sm:$0xff]   ;;  %p1430_p11 = scmp.lt.s32.totalorder %s1030_s9, %s1030_s9 }
  0x4f   :  { %711 = vmatprep.mubr.bf16.mxu1 %v69_v0  ;;  %v1273_v11 = vld [vmem:[#allocation5 + $0x234] ss:$8 sps:$4 sm:$0xff]   ;;  %v1271_v12 = vld [vmem:[#allocation5 + $0x230] ss:$8 sps:$4 sm:$0xff]   ;;  %v1324_v13 = vld [vmem:[#allocation5 + $0xe0] ss:$8 sps:$4 sm:$0xff]  }
  0x50   :  { %v1328_v14 = vld [vmem:[#allocation5 + $0xf4] ss:$8 sps:$4 sm:$0xff]   ;;  %v1279_v15 = vld [vmem:[#allocation5 + $0x244] ss:$8 sps:$4 sm:$0xff]   ;;  %v1330_v16 = vld [vmem:[#allocation5 + $0xf0] ss:$8 sps:$4 sm:$0xff]  }
  0x51   :  { %733 = vmatpush1.bf16.msra.mxu0 %v1216_v17  ;;  %690 = vmatpush1.bf16.msra.mxu1 %v1270_v35  ;;  %v61_v17 = vld [vmem:[#allocation2] sm:$0xff]  ;;  %v1285_v20 = vld [vmem:[#allocation5 + $0x254] ss:$8 sps:$4 sm:$0xff]   ;;  %v1295_v32 = vld [vmem:[#allocation5 + $0x270] ss:$8 sps:$4 sm:$0xff]   ;;  %s1425_s10 = scalar_lea.vmem %s1030_s9, 128 }
  0x52   :  { %734 = vmatprep.subr.bf16.mxu0 %v1217_v18  ;;  %691 = vmatprep.subr.bf16.mxu1 %v1274_v36  ;;  %v1277_v18 = vld [vmem:[#allocation5 + $0x240] ss:$8 sps:$4 sm:$0xff]   ;;  %v1339_v19 = vld [vmem:[#allocation5 + $0x304] ss:$8 sps:$4 sm:$0xff]   ;;  %v68_v21 = vpack.c.bf16 %v61_v17, %v61_v17  ;;  %v67_v27 = vld [vmem:[#allocation2 + $0x30] sm:$0xff]  ;;  %p1426_p10 = scmp.ne.s32.totalorder %s1030_s9, %s1425_s10  ;;  %p1431_p12 = scmp.lt.s32.totalorder %s1425_s10, %s1425_s10 }
  0x53   :  { %v1337_v22 = vld [vmem:[#allocation5 + $0x300] ss:$8 sps:$4 sm:$0xff]   ;;  %v1291_v25 = vld [vmem:[#allocation5 + $0x264] ss:$8 sps:$4 sm:$0xff]   ;;  %v1344_v31 = vld [vmem:[#allocation7] sm:$0xff]  }
  0x54   :  { %v1289_v28 = vld [vmem:[#allocation5 + $0x260] ss:$8 sps:$4 sm:$0xff]   ;;  %v1346_v35 = vld [vmem:[#allocation7 + $0x8] sm:$0xff]   ;;  %p1432_p13 = por %p1431_p12, %p1430_p11 }
  0x55   :  { %735 = vmatpush1.bf16.msra.mxu0 %v1219_v23  ;;  %692 = vmatpush1.bf16.msra.mxu1 %v1276_v39  ;;  %v1283_v23 = vld [vmem:[#allocation5 + $0x250] ss:$8 sps:$4 sm:$0xff]   ;;  %v1301_v36 = vld [vmem:[#allocation5 + $0x280] ss:$8 sps:$4 sm:$0xff]  }
  0x56   :  { %736 = vmatprep.subr.bf16.mxu0 %v1220_v24  ;;  %693 = vmatprep.subr.bf16.mxu1 %v1280_v40  ;;  %v1343_v24 = vld [vmem:[#allocation7 + $0x40] sm:$0xff]   ;;  %v1348_v39 = vld [vmem:[#allocation7 + $0x10] sm:$0xff]   ;;  %v1349_v55 = vld [vmem:[#allocation7 + $0x58] sm:$0xff]   ;;  %p1433_p0 = pnand %p1432_p13, %p1426_p10 }
  0x57   :  { %v1307_v40 = vld [vmem:[#allocation5 + $0x290] ss:$8 sps:$4 sm:$0xff]   ;;  %v1355_v61 = vld [vmem:[#allocation7 + $0x70] sm:$0xff]   ;;  %v1358_v0 = vld [vmem:[#allocation7 + $0x38] sm:$0xff]  }
  0x59   :  { %737 = vmatpush1.bf16.msra.mxu0 %v1222_v26  ;;  %694 = vmatpush1.bf16.msra.mxu1 %v1282_v43  ;;  %v1460_v26 = vmov 0   ;;  %v1321_v43 = vld [vmem:[#allocation5 + $0x2b4] ss:$8 sps:$4 sm:$0xff]  }
  0x5a   :  { %738 = vmatprep.subr.bf16.mxu0 %v1223_v29  ;;  %695 = vmatprep.subr.bf16.mxu1 %v1286_v44  ;;  %v1297_v29 = vld [vmem:[#allocation5 + $0x274] ss:$8 sps:$4 sm:$0xff]   ;;  %v1319_v44 = vld [vmem:[#allocation5 + $0x2b0] ss:$8 sps:$4 sm:$0xff]  }
  0x5d   :  { %739 = vmatpush1.bf16.msra.mxu0 %v1225_v30  ;;  %696 = vmatpush1.bf16.msra.mxu1 %v1288_v47  ;;  %v74_v30 = vpack.c.bf16 %v67_v27, %v67_v27  ;;  %v1333_v47 = vld [vmem:[#allocation5 + $0x2d4] ss:$8 sps:$4 sm:$0xff]  }
  0x5e   :  { %740 = vmatprep.subr.bf16.mxu0 %v1226_v33  ;;  %697 = vmatprep.subr.bf16.mxu1 %v1292_v48  ;;  %v1345_v33 = vld [vmem:[#allocation7 + $0x48] sm:$0xff]  }
  0x5f   :  { %v1331_v48 = vld [vmem:[#allocation5 + $0x2d0] ss:$8 sps:$4 sm:$0xff]  }
  0x61   :  { %741 = vmatpush1.bf16.msra.mxu0 %v1228_v34  ;;  %698 = vmatpush1.bf16.msra.mxu1 %v1294_v51  ;;  %v1303_v34 = vld [vmem:[#allocation5 + $0x284] ss:$8 sps:$4 sm:$0xff]   ;;  %v1342_v51 = vld [vmem:[#allocation5 + $0x2f4] ss:$8 sps:$4 sm:$0xff]  }
  0x62   :  { %742 = vmatprep.subr.bf16.mxu0 %v1229_v37  ;;  %699 = vmatprep.subr.bf16.mxu1 %v1298_v52  ;;  %v1347_v37 = vld [vmem:[#allocation7 + $0x50] sm:$0xff]   ;;  %v1340_v52 = vld [vmem:[#allocation5 + $0x2f0] ss:$8 sps:$4 sm:$0xff]  }
  0x65   :  { %743 = vmatpush1.bf16.msra.mxu0 %v1231_v38  ;;  %700 = vmatpush1.bf16.msra.mxu1 %v1300_v56  ;;  %v1309_v38 = vld [vmem:[#allocation5 + $0x294] ss:$8 sps:$4 sm:$0xff]   ;;  %v1350_v56 = vld [vmem:[#allocation7 + $0x18] sm:$0xff]  }
  0x66   :  { %744 = vmatprep.subr.bf16.mxu0 %v1232_v41  ;;  %701 = vmatprep.subr.bf16.mxu1 %v1304_v57  ;;  %v1315_v41 = vld [vmem:[#allocation5 + $0x2a4] ss:$8 sps:$4 sm:$0xff]   ;;  %v1351_v57 = vld [vmem:[#allocation7 + $0x60] sm:$0xff]  }
  0x69   :  { %745 = vmatpush1.bf16.msra.mxu0 %v1234_v42  ;;  %702 = vmatpush1.bf16.msra.mxu1 %v1306_v60  ;;  %v1313_v42 = vld [vmem:[#allocation5 + $0x2a0] ss:$8 sps:$4 sm:$0xff]   ;;  %v1354_v60 = vld [vmem:[#allocation7 + $0x28] sm:$0xff]  }
  0x6a   :  { %746 = vmatprep.subr.bf16.mxu0 %v1235_v45  ;;  %703 = vmatprep.subr.bf16.mxu1 %v1310_v63  ;;  %v1327_v45 = vld [vmem:[#allocation5 + $0x2c4] ss:$8 sps:$4 sm:$0xff]  }
  0x6b   :  { %v1357_v63 = vld [vmem:[#allocation7 + $0x78] sm:$0xff]  }
  0x6d   :  { %747 = vmatpush1.bf16.msra.mxu0 %v1237_v46  ;;  %704 = vmatpush1.bf16.msra.mxu1 %v1312_v2  ;;  %v1325_v46 = vld [vmem:[#allocation5 + $0x2c0] ss:$8 sps:$4 sm:$0xff]  }
  0x6e   :  { %748 = vmatprep.subr.bf16.mxu0 %v1241_v49  ;;  %705 = vmatprep.subr.bf16.mxu1 %v1316_v5  ;;  %v1336_v49 = vld [vmem:[#allocation5 + $0x2e4] ss:$8 sps:$4 sm:$0xff]  }
  0x71   :  { %749 = vmatpush1.bf16.msra.mxu0 %v1243_v50  ;;  %706 = vmatpush1.bf16.msra.mxu1 %v1318_v9  ;;  %v1334_v50 = vld [vmem:[#allocation5 + $0x2e0] ss:$8 sps:$4 sm:$0xff]   ;;  %v175_v9 = vlaneseq }
  0x72   :  { %750 = vmatprep.subr.bf16.mxu0 %v1247_v53  ;;  %707 = vmatprep.subr.bf16.mxu1 %v1322_v10  ;;  %v65_v53 = vld [vmem:[#allocation2 + $0x20] sm:$0xff] }
  0x73   :  { %v176_v10 = vshrl.u32 %v175_v9, 7 }
  0x75   :  { %751 = vmatpush1.bf16.msra.mxu0 %v1249_v54  ;;  %708 = vmatpush1.bf16.msra.mxu1 %v1324_v13  ;;  %v72_v54 = vpack.c.bf16 %v65_v53, %v65_v53  ;;  %v181_v13 = vsub.s32 1, %v176_v10 }
  0x76   :  { %761 = vmatprep.subr.bf16.mxu0 %v1255_v58  ;;  %709 = vmatprep.subr.bf16.mxu1 %v1328_v14  ;;  %v1352_v58 = vld [vmem:[#allocation7 + $0x20] sm:$0xff]  }
  0x78   :  { %753 = vmatmul.mubr.bf16.vlgmr.msra.gmra.mrb[0].mxu0 %v70_v59  ;;  %v1353_v59 = vld [vmem:[#allocation7 + $0x68] sm:$0xff]  }
  0x79   :  { %762 = vmatpush1.bf16.msra.mxu0 %v1253_v62  ;;  %793 = vmatprep.mubr.bf16.mxu0 %v73_v6  ;;  %v1356_v62 = vld [vmem:[#allocation7 + $0x30] sm:$0xff]  }
  0x7a   :  { %763 = vmatprep.subr.bf16.mxu0 %v1261_v1  ;;  %710 = vmatpush1.bf16.msra.mxu1 %v1330_v16 }
  0x7b   :  { %802 = vmatprep.subr.bf16.mxu1 %v1339_v19 }
  0x7d   :  { %764 = vmatpush1.bf16.msra.mxu0 %v1259_v4  ;;  %712 = vmatmul.mubr.bf16.vlgmr.msra.gmra.mrb[0].mxu1 %v68_v21 }
  0x7e   :  { %765 = vmatprep.subr.bf16.mxu0 %v1267_v7  ;;  %803 = vmatpush1.bf16.msra.mxu1 %v1337_v22 }
  0x7f   :  { %834 = vmatprep.mubr.bf16.mxu1 %v1460_v26  ;;  %1155 = vmatprep.subr.bf16.mxu1 %v1343_v24 }
  0x81   :  { %766 = vmatpush1.bf16.msra.mxu0 %v1265_v8 }
  0x82   :  { %767 = vmatprep.subr.bf16.mxu0 %v1273_v11  ;;  %v177_v11 = vsub.s32 0, %v176_v10 }
  0x85   :  { %768 = vmatpush1.bf16.msra.mxu0 %v1271_v12  ;;  %1137 = vmatmul.mubr.msk.bf16.vlgmr.msra.gmra.mrb[4].mxu1 %vm675_vm0, %v74_v30  ;;  %v173_v12 = vld [vmem:[%s1548_s2] sm:$0x3] }
  0x86   :  { %769 = vmatprep.subr.bf16.mxu0 %v1279_v15  ;;  %1156 = vmatpush3.bf16.msra.mxu1 %v1344_v31  ;;  %v178_v14 = vrot.slane %v173_v12, %v177_v11  ;;  %v182_v15 = vrot.slane %v173_v12, %v181_v13  ;;  %v1138_v31 = vld [vmem:[%s1550_s4] ss:$0 sm:$0xff] }
  0x87   :  { %1157 = vmatprep.subr.bf16.mxu1 %v1345_v33 }
  0x89   :  { %770 = vmatpush1.bf16.msra.mxu0 %v1277_v18 }
  0x8a   :  { %771 = vmatprep.subr.bf16.mxu0 %v1285_v20  ;;  %1158 = vmatpush3.bf16.msra.mxu1 %v1346_v35 }
  0x8b   :  { %1159 = vmatprep.subr.bf16.mxu1 %v1347_v37 }
  0x8d   :  { %772 = vmatpush1.bf16.msra.mxu0 %v1283_v23 }
  0x8e   :  { %773 = vmatprep.subr.bf16.mxu0 %v1291_v25  ;;  %1160 = vmatpush3.bf16.msra.mxu1 %v1348_v39 }
  0x8f   :  { %1161 = vmatprep.subr.bf16.mxu1 %v1349_v55 }
  0x91   :  { %774 = vmatpush1.bf16.msra.mxu0 %v1289_v28 }
  0x92   :  { %775 = vmatprep.subr.bf16.mxu0 %v1297_v29  ;;  %1162 = vmatpush3.bf16.msra.mxu1 %v1350_v56 }
  0x93   :  { %1163 = vmatprep.subr.bf16.mxu1 %v1351_v57 }
  0x95   :  { %776 = vmatpush1.bf16.msra.mxu0 %v1295_v32 }
  0x96   :  { %777 = vmatprep.subr.bf16.mxu0 %v1303_v34  ;;  %1164 = vmatpush3.bf16.msra.mxu1 %v1352_v58 }
  0x97   :  { %1165 = vmatprep.subr.bf16.mxu1 %v1353_v59 }
  0x99   :  { %778 = vmatpush1.bf16.msra.mxu0 %v1301_v36 }
  0x9a   :  { %779 = vmatprep.subr.bf16.mxu0 %v1309_v38  ;;  %1166 = vmatpush3.bf16.msra.mxu1 %v1354_v60 }
  0x9b   :  { %1167 = vmatprep.subr.bf16.mxu1 %v1355_v61 }
  0x9d   :  { %780 = vmatpush1.bf16.msra.mxu0 %v1307_v40 }
  0x9e   :  { %781 = vmatprep.subr.bf16.mxu0 %v1315_v41  ;;  %1168 = vmatpush3.bf16.msra.mxu1 %v1356_v62 }
  0x9f   :  { %1169 = vmatprep.subr.bf16.mxu1 %v1357_v63 }
  0xa1   :  { %782 = vmatpush1.bf16.msra.mxu0 %v1313_v42 }
  0xa2   :  { %783 = vmatprep.subr.bf16.mxu0 %v1321_v43  ;;  %1170 = vmatpush3.bf16.msra.mxu1 %v1358_v0 }
  0xa5   :  { %784 = vmatpush1.bf16.msra.mxu0 %v1319_v44 }
  0xa6   :  { %785 = vmatprep.subr.bf16.mxu0 %v1327_v45 }
  0xa9   :  { %786 = vmatpush1.bf16.msra.mxu0 %v1325_v46 }
  0xaa   :  { %787 = vmatprep.subr.bf16.mxu0 %v1333_v47 }
  0xad   :  { %788 = vmatpush1.bf16.msra.mxu0 %v1331_v48 }
  0xae   :  { %789 = vmatprep.subr.bf16.mxu0 %v1336_v49 }
  0xb1   :  { %790 = vmatpush1.bf16.msra.mxu0 %v1334_v50 }
  0xb2   :  { %791 = vmatprep.subr.bf16.mxu0 %v1342_v51 }
  0xb5   :  { %792 = vmatpush1.bf16.msra.mxu0 %v1340_v52 }
  0xb8   :  { %794 = vmatmul.mubr.bf16.vlgmr.msra.gmra.mrb[0].mxu0 %v72_v54 }
 0x150   :  { %v713_v1 = vpop.f32.mrb[0].mxu1 }
 0x151   :  { %v715_v2 = vpop.f32.mrb[1].mxu1  ;;  %v714_v16 = vadd.f32 %v713_v1, %v178_v14 }
 0x152   :  { %v717_v3 = vpop.f32.mrb[2].mxu1  ;;  %v716_v17 = vadd.f32 %v715_v2, %v182_v15 }
 0x153   :  { %v718_v4 = vpop.f32.mrb[3].mxu1 }
 0x158   :  { %v836_v5 = vpop.f32.mrb[4].mxu1 }
 0x159   :  { %v838_v6 = vpop.f32.mrb[5].mxu1 }
 0x15a   :  { %v840_v7 = vpop.f32.mrb[6].mxu1 }
 0x15b   :  { %v841_v8 = vpop.f32.mrb[7].mxu1 }
 0x18b   :  { %v795_v18 = vpop.f32.mrb[0].mxu0 }
 0x18c   :  { %v1178_v19 = vadd.f32 %v795_v18, %v714_v16  ;;  %v797_v20 = vpop.f32.mrb[1].mxu0 }
 0x18d   :  { %v1181_v21 = vadd.f32 %v797_v20, %v716_v17  ;;  %v799_v22 = vpop.f32.mrb[2].mxu0 }
 0x18e   :  { %v1179_v23 = vadd.f32 %v1178_v19, %v836_v5  ;;  %v800_v24 = vpop.f32.mrb[3].mxu0 }
 0x18f   :  { %v1182_v25 = vadd.f32 %v1181_v21, %v838_v6 }
 0x190   :  { %v843_v26 = vmax.f32 %v1179_v23, 0.0 }
 0x191   :  { %v844_v27 = vmax.f32 %v1182_v25, 0.0 }
 0x192   :  { %v845_v29 = vpack.c.bf16 %v843_v26, %v843_v26 }
 0x193   :  { %v846_v28 = vpack.c.bf16 %v844_v27, %v844_v27 }
 0x195   :  { %1014 = vmatprep.mubr.bf16.mxu1 %v846_v28 }
 0x196   :  { %1015 = vmatmul.mubr.bf16.vlgmr.msra.gmra.mrb[8].mxu1 %v845_v29 }
 0x269   :  { %v1171_v30 = vpop.f32.mrb[8].mxu1 }
 0x26a   :  { %v1172_v32 = vpop.f32.mrb[9].mxu1 }
 0x26b   :  { %v1173_v33 = vadd.f32 %v1172_v32, %v1171_v30  ;;  %v1174_v34 = vpop.f32.mrb[10].mxu1 }
 0x26c   :  { %v1175_v35 = vpop.f32.mrb[11].mxu1 }
 0x26d   :  { %v1017_v36 = vadd.f32 %v1173_v33, %v1138_v31 }
 0x26f   :  { %1022 = vst [vmem:[#allocation8] sm:$0xff] %v1017_v36 }
 0x270   :  { %1436 = shalt.err (!%p1433_p0)
}
 0x271   :  { %s1437_s4 = scalar_lea.hbm %s1551_s5, 128 }
 0x272   :  { %p1438_p1 = scmp.ne.s32.totalorder %s1551_s5, %s1437_s4  ;;  %p1441_p2 = scmp.lt.u32.totalorder %s1437_s4, %s1551_s5 }
 0x274   :  { %p1443_p3 = pnand %p1441_p2, %p1438_p1 }
 0x276   :  { %1446 = shalt.err (!%p1443_p3)
}
 0x277   :  { %1032 = dma.vmem_to_hbm [thread:$0]  %s1030_s9, 128, %s1551_s5, [#allocation4]  }
 0x278   :  { %1451 = dma.done.wait [#allocation4], 128  }
 0x279   :  { %1452 = vsyncadd [#allocation4], 4294967168 }
 0x27a   :  { %1036 = vsyncpa [#allocation3], 1 }
 0x27b   :  { %1037 = vsyncpa [#allocation6], 1 }
 0x27c   :  { %1038 = vsyncpa [#allocation4], 1 }

</bundles_post_ra>
